<compile_context>
chip_gen: v5e
topology: v5e:2x2
jax: 0.10.0
libtpu: 0.0.40
codegen_flags: <defaults>
</compile_context>

<pallas_src>
import jax
import jax.numpy as jnp
import numpy as np
from jax import lax
from jax.experimental import pallas as pl
from jax.experimental.pallas import tpu as pltpu

EPS = 1e-5                       # PyTorch BatchNorm default eps
VMEM_LIMIT = 48 * 1024 * 1024    # explicit scoped-VMEM budget (safe on v5e/v6e/v7x)


def _choose_n_tile(n, plane, target_bytes=1 << 20):
    """Lane-dim tile: multiple of 128 (dense lanes, unmasked stores), divides n,
    sized so the f32 x tile is <= ~1 MiB (amortizes the ~0.35us per-grid-step cost)."""
    if n < 128 or n % 128 != 0:
        return n                       # full extent is always a legal block
    best = 128
    t = 128
    while t <= n:
        if n % t == 0 and t * plane * 4 <= target_bytes:
            best = t
        t += 128
    return best


def _spatial_gcn_kernel(x_ref, wq_ref, bq_ref, wv_ref, bv_ref, wk_ref, bk_ref,
                        wg_ref, bnwg_ref, wo_ref, bnout_ref,
                        o_ref, xcache_ref, acc_ref, p_ref):
    ph = pl.program_id(1)            # 0: AV accumulation, 1: output emission
    t = pl.program_id(2)             # spatial (lane) tile index
    last_t = pl.num_programs(2) - 1

    @pl.when((ph == 0) & (t == 0))
    def _init():
        acc_ref[...] = jnp.zeros_like(acc_ref)

    @pl.when(ph == 0)
    def _accumulate():
        xt = x_ref[0]                                   # (P, TN) f32 tile from HBM
        xcache_ref[t] = xt                              # cache: x read from HBM once
        xb = xt.astype(jnp.bfloat16)
        q = jnp.dot(wq_ref[...], xb, preferred_element_type=jnp.float32) + bq_ref[...]
        v = jnp.dot(wv_ref[...], xb, preferred_element_type=jnp.float32) + bv_ref[...]
        # AV += q @ v^T (contract the spatial lane dim); bf16 MXU operands, f32 accum.
        acc_ref[...] += lax.dot_general(
            q.astype(jnp.bfloat16), v.astype(jnp.bfloat16),
            (((1,), (1,)), ((), ())), preferred_element_type=jnp.float32)

        @pl.when(t == last_t)
        def _finalize():                                # softmax(AV, dim=-1), per batch
            av = acc_ref[...]                           # (C, C) f32
            m = jnp.max(av, axis=-1, keepdims=True)
            e = jnp.exp(av - m)
            s = jnp.sum(e, axis=-1, keepdims=True)
            p_ref[...] = (e * pl.reciprocal(s, approx=True)).astype(jnp.bfloat16)

    @pl.when(ph == 1)
    def _emit():
        xt = xcache_ref[t]                              # (P, TN) f32 from VMEM cache
        xb = xt.astype(jnp.bfloat16)
        k = jnp.dot(wk_ref[...], xb, preferred_element_type=jnp.float32) + bk_ref[...]
        # AV2 = softmax(AV)^T @ k  (channel-major): contract dim 0 of both operands.
        av2 = lax.dot_general(p_ref[...], k.astype(jnp.bfloat16),
                              (((0,), (0,)), ((), ())),
                              preferred_element_type=jnp.float32)
        avw = jnp.dot(wg_ref[...], av2.astype(jnp.bfloat16),
                      preferred_element_type=jnp.float32)           # conv_wg
        avw = avw * bnwg_ref[:, 0:1] + bnwg_ref[:, 1:2]             # folded bn_wg
        y = jnp.dot(wo_ref[...], avw.astype(jnp.bfloat16),
                    preferred_element_type=jnp.float32)             # out conv
        y = y * bnout_ref[:, 0:1] + bnout_ref[:, 1:2]               # folded bias + BN2d
        o_ref[0] = jnp.maximum(y + xt, 0.0)                         # ReLU + f32 residual


def spatial_gcn(x_nchw, params, n_tile=None):
    b, plane, h, w = x_nchw.shape
    C = plane // 2
    N = h * w
    if n_tile is None:
        n_tile = _choose_n_tile(N, plane)
    assert N % n_tile == 0 and (n_tile % 128 == 0 or n_tile == N)
    T = N // n_tile

    cache_bytes = plane * N * 4
    assert cache_bytes <= 24 * 1024 * 1024, "per-batch x cache would not fit VMEM"

    # NCHW -> (B, P, N): pure reshape (no transpose / cast over HBM).  Activations stay
    # f32 (exact residual); only the tiny weights are cast to bf16 for the MXU.
    x_flat = x_nchw.reshape(b, plane, N)

    bf = lambda a: a.astype(jnp.bfloat16)
    wq, wv, wk = bf(params["wq"]), bf(params["wv"]), bf(params["wk"])
    wg, wo = bf(params["wg"]), bf(params["wo"])
    bq = params["bq"][:, None]                                       # (C, 1)
    bv = params["bv"][:, None]
    bk = params["bk"][:, None]

    # Fold BatchNorm (+ out-conv bias) into per-channel scale/shift tables.
    g_w, beta_w, mu_w, var_w = params["bnw"]
    s_w = g_w * lax.rsqrt(var_w + EPS)
    bn_wg = jnp.stack([s_w, beta_w - mu_w * s_w], axis=1)                    # (C, 2)
    g_o, beta_o, mu_o, var_o = params["bno"]
    s_o = g_o * lax.rsqrt(var_o + EPS)
    bn_out = jnp.stack([s_o, beta_o + (params["bo"] - mu_o) * s_o], axis=1)  # (P, 2)

    const = lambda shape: pl.BlockSpec(shape, lambda i, j, k: (0, 0))
    # x: stream tiles in phase 0; in phase 1 pin to the already-resident last tile
    # (kernel reads the VMEM cache there), so x is DMA'd from HBM exactly once.
    x_spec = pl.BlockSpec((1, plane, n_tile),
                          lambda i, j, k: (i, 0, k * (1 - j) + (T - 1) * j))
    # out: block 0 during phase 0 (never flushed before it is written), tile k in phase 1.
    out_spec = pl.BlockSpec((1, plane, n_tile), lambda i, j, k: (i, 0, j * k))

    out_flat = pl.pallas_call(
        _spatial_gcn_kernel,
        out_shape=jax.ShapeDtypeStruct((b, plane, N), jnp.float32),
        grid=(b, 2, T),
        in_specs=[x_spec,
                  const((C, plane)), const((C, 1)),     # node_q  W, b
                  const((C, plane)), const((C, 1)),     # node_v  W, b
                  const((C, plane)), const((C, 1)),     # node_k  W, b
                  const((C, C)),                        # conv_wg W (no bias)
                  const((C, 2)),                        # bn_wg   [scale | shift]
                  const((plane, C)),                    # out conv W
                  const((plane, 2))],                   # out bias + BN2d [scale | shift]
        out_specs=out_spec,
        scratch_shapes=[pltpu.VMEM((T, plane, n_tile), jnp.float32),  # per-batch x cache
                        pltpu.VMEM((C, C), jnp.float32),              # AV accumulator
                        pltpu.VMEM((C, C), jnp.bfloat16)],            # softmax(AV)
        compiler_params=pltpu.CompilerParams(
            dimension_semantics=("parallel", "arbitrary", "arbitrary"),
            vmem_limit_bytes=VMEM_LIMIT),
    )(x_flat, wq, bq, wv, bv, wk, bk, wg, bn_wg, wo, bn_out)

    return out_flat.reshape(b, plane, h, w)


def spatial_gcn_ref(x_nchw, p):
    """Pure-JAX f32 reference (HIGHEST matmul precision) mirroring the PyTorch module."""
    b, plane, h, w = x_nchw.shape
    N = h * w
    hp = lax.Precision.HIGHEST
    x = x_nchw.reshape(b, plane, N)                                   # (B, P, N)
    conv = lambda w_, b_: jnp.einsum("cp,bpn->bcn", w_, x, precision=hp) + b_[None, :, None]
    q = conv(p["wq"], p["bq"])
    v = conv(p["wv"], p["bv"])
    k = conv(p["wk"], p["bk"])
    av = jnp.einsum("bcn,bdn->bcd", q, v, precision=hp)               # (B, C, C)
    av = jax.nn.softmax(av, axis=-1)
    av2 = jnp.einsum("bcd,bcn->bdn", av, k, precision=hp)             # softmax(AV)^T @ k
    avw = jnp.einsum("oc,bcn->bon", p["wg"], av2, precision=hp)       # conv_wg
    g, bt, mu, vr = p["bnw"]
    avw = (avw - mu[None, :, None]) * (g * lax.rsqrt(vr + EPS))[None, :, None] + bt[None, :, None]
    y = jnp.einsum("pc,bcn->bpn", p["wo"], avw, precision=hp) + p["bo"][None, :, None]
    go, bto, muo, vro = p["bno"]
    y = (y - muo[None, :, None]) * (go * lax.rsqrt(vro + EPS))[None, :, None] + bto[None, :, None]
    out = jnp.maximum(y + x, 0.0)
    return out.reshape(b, plane, h, w)


def make_params(key, plane):
    C = plane // 2
    ks = jax.random.split(key, 11)
    n = lambda k, s, scale: jax.random.normal(k, s, jnp.float32) * scale

    def bn_pack(k, ch):
        k1, k2, k3, k4 = jax.random.split(k, 4)
        gamma = 1.0 + 0.1 * jax.random.normal(k1, (ch,), jnp.float32)
        beta = 0.1 * jax.random.normal(k2, (ch,), jnp.float32)
        mean = 0.1 * jax.random.normal(k3, (ch,), jnp.float32)
        var = 0.5 + jnp.abs(jax.random.normal(k4, (ch,), jnp.float32)) * 0.5
        return jnp.stack([gamma, beta, mean, var], axis=0)            # (4, ch)

    return {
        # 1x1 conv weights in PyTorch (out_ch, in_ch) orientation.
        "wk": n(ks[0], (C, plane), 0.15), "bk": n(ks[1], (C,), 0.1),
        "wv": n(ks[2], (C, plane), 0.15), "bv": n(ks[3], (C,), 0.1),
        "wq": n(ks[4], (C, plane), 0.15), "bq": n(ks[5], (C,), 0.1),
        "wg": n(ks[6], (C, C), 0.3),                                   # conv_wg (no bias)
        "bnw": bn_pack(ks[7], C),
        "wo": n(ks[8], (plane, C), 0.2), "bo": n(ks[9], (plane,), 0.1),
        "bno": bn_pack(ks[10], plane),
    }


if __name__ == "__main__":
    key = jax.random.PRNGKey(0)
    k_x, k_p = jax.random.split(key)

    plane, H, W, B = 8, 16, 16, 2
    x = jax.random.normal(k_x, (B, plane, H, W), jnp.float32)        # NCHW like PyTorch
    params = make_params(k_p, plane)

    # n_tile=128 -> T=2: exercises multi-tile AV accumulation, the VMEM x cache and the
    # two-phase grid; the auto-chooser would pick the full N=256 here.
    out = jax.block_until_ready(spatial_gcn(x, params, n_tile=128))
    ref = jax.block_until_ready(spatial_gcn_ref(x, params))

    # Matmul operands are bf16 (f32 accumulation) -> slightly loose tolerance vs pure f32.
    np.testing.assert_allclose(np.asarray(out), np.asarray(ref), rtol=5e-2, atol=6e-2)

    print("KERNEL_OK")
</pallas_src>

<mosaic_0001>
module attributes {stable_mosaic.version = 11 : i64} {
  func.func @_spatial_gcn_kernel(%arg0: i32, %arg1: i32, %arg2: i32, %arg3: memref<1x8x128xf32, #tpu.memory_space<vmem>>, %arg4: memref<4x8xbf16, #tpu.memory_space<vmem>>, %arg5: memref<4x1xf32, #tpu.memory_space<vmem>>, %arg6: memref<4x8xbf16, #tpu.memory_space<vmem>>, %arg7: memref<4x1xf32, #tpu.memory_space<vmem>>, %arg8: memref<4x8xbf16, #tpu.memory_space<vmem>>, %arg9: memref<4x1xf32, #tpu.memory_space<vmem>>, %arg10: memref<4x4xbf16, #tpu.memory_space<vmem>>, %arg11: memref<4x2xf32, #tpu.memory_space<vmem>>, %arg12: memref<8x4xbf16, #tpu.memory_space<vmem>>, %arg13: memref<8x2xf32, #tpu.memory_space<vmem>>, %arg14: memref<1x8x128xf32, #tpu.memory_space<vmem>>, %arg15: memref<2x8x128xf32, #tpu.memory_space<vmem>>, %arg16: memref<4x4xf32, #tpu.memory_space<vmem>>, %arg17: memref<4x4xbf16, #tpu.memory_space<vmem>>) attributes {dimension_semantics = [#tpu.dimension_semantics<parallel>, #tpu.dimension_semantics<arbitrary>, #tpu.dimension_semantics<arbitrary>], iteration_bounds = array<i64: 2, 2, 2>, scalar_prefetch = 0 : i64, scratch_operands = 3 : i64, tpu.core_type = #tpu.core_type<tc>, window_params = [{transform_indices = @transform_0, window_bounds = array<i64: 1, 8, 128>}, {pipeline_mode = #tpu.pipeline_mode<synchronous>, transform_indices = @transform_1, window_bounds = array<i64: 4, 8>}, {pipeline_mode = #tpu.pipeline_mode<synchronous>, transform_indices = @transform_2, window_bounds = array<i64: 4, 1>}, {pipeline_mode = #tpu.pipeline_mode<synchronous>, transform_indices = @transform_3, window_bounds = array<i64: 4, 8>}, {pipeline_mode = #tpu.pipeline_mode<synchronous>, transform_indices = @transform_4, window_bounds = array<i64: 4, 1>}, {pipeline_mode = #tpu.pipeline_mode<synchronous>, transform_indices = @transform_5, window_bounds = array<i64: 4, 8>}, {pipeline_mode = #tpu.pipeline_mode<synchronous>, transform_indices = @transform_6, window_bounds = array<i64: 4, 1>}, {pipeline_mode = #tpu.pipeline_mode<synchronous>, transform_indices = @transform_7, window_bounds = array<i64: 4, 4>}, {pipeline_mode = #tpu.pipeline_mode<synchronous>, transform_indices = @transform_8, window_bounds = array<i64: 4, 2>}, {pipeline_mode = #tpu.pipeline_mode<synchronous>, transform_indices = @transform_9, window_bounds = array<i64: 8, 4>}, {pipeline_mode = #tpu.pipeline_mode<synchronous>, transform_indices = @transform_10, window_bounds = array<i64: 8, 2>}, {transform_indices = @transform_11, window_bounds = array<i64: 1, 8, 128>}]} {
    %c0_i32 = arith.constant 0 : i32
    %0 = arith.cmpi eq, %arg1, %c0_i32 : i32
    %c0_i32_0 = arith.constant 0 : i32
    %1 = arith.cmpi eq, %arg2, %c0_i32_0 : i32
    %2 = arith.andi %0, %1 : i1
    %3 = arith.extui %2 : i1 to i32
    %c0_i32_1 = arith.constant 0 : i32
    %4 = arith.cmpi ne, %3, %c0_i32_1 : i32
    scf.if %4 {
      %cst = arith.constant 0.000000e+00 : f32
      %11 = vector.broadcast %cst : f32 to vector<4x4xf32>
      %c0 = arith.constant 0 : index
      %c0_5 = arith.constant 0 : index
      %12 = vector.load %arg16[%c0, %c0_5] : memref<4x4xf32, #tpu.memory_space<vmem>>, vector<4x4xf32>
      tpu.vector_store %arg16[%c0, %c0_5], %11 {strides = array<i32>} : memref<4x4xf32, #tpu.memory_space<vmem>>, vector<4x4xf32>,
    } else {
    }
    %c0_i32_2 = arith.constant 0 : i32
    %5 = arith.cmpi eq, %arg1, %c0_i32_2 : i32
    %6 = arith.extui %5 : i1 to i32
    %c0_i32_3 = arith.constant 0 : i32
    %7 = arith.cmpi ne, %6, %c0_i32_3 : i32
    scf.if %7 {
      %c0 = arith.constant 0 : index
      %c0_5 = arith.constant 0 : index
      %c0_6 = arith.constant 0 : index
      %11 = vector.load %arg3[%c0, %c0_5, %c0_6] : memref<1x8x128xf32, #tpu.memory_space<vmem>>, vector<1x8x128xf32>
      %12 = vector.shape_cast %11 : vector<1x8x128xf32> to vector<8x128xf32>
      %13 = arith.index_cast %arg2 : i32 to index
      %c0_7 = arith.constant 0 : index
      %c0_8 = arith.constant 0 : index
      %14 = vector.load %arg15[%13, %c0_7, %c0_8] : memref<2x8x128xf32, #tpu.memory_space<vmem>>, vector<1x8x128xf32>
      %15 = vector.shape_cast %14 : vector<1x8x128xf32> to vector<8x128xf32>
      %16 = vector.shape_cast %12 : vector<8x128xf32> to vector<1x8x128xf32>
      tpu.vector_store %arg15[%13, %c0_7, %c0_8], %16 {strides = array<i32>} : memref<2x8x128xf32, #tpu.memory_space<vmem>>, vector<1x8x128xf32>,
      %17 = arith.truncf %12 : vector<8x128xf32> to vector<8x128xbf16>
      %c0_9 = arith.constant 0 : index
      %c0_10 = arith.constant 0 : index
      %18 = vector.load %arg4[%c0_9, %c0_10] : memref<4x8xbf16, #tpu.memory_space<vmem>>, vector<4x8xbf16>
      %cst = arith.constant dense<0.000000e+00> : vector<4x128xf32>
      %19 = tpu.matmul %18, %17, %cst {dimension_numbers = #tpu.dot_dimension_numbers<[1], [0], [0], [1], [0, 0, 1, 1], [], []>} : vector<4x8xbf16>, vector<8x128xbf16>, vector<4x128xf32> -> vector<4x128xf32>
      %c0_11 = arith.constant 0 : index
      %c0_12 = arith.constant 0 : index
      %20 = vector.load %arg5[%c0_11, %c0_12] : memref<4x1xf32, #tpu.memory_space<vmem>>, vector<4x1xf32>
      %21 = vector.broadcast %20 : vector<4x1xf32> to vector<4x128xf32>
      %22 = arith.addf %19, %21 : vector<4x128xf32>
      %c0_13 = arith.constant 0 : index
      %c0_14 = arith.constant 0 : index
      %23 = vector.load %arg6[%c0_13, %c0_14] : memref<4x8xbf16, #tpu.memory_space<vmem>>, vector<4x8xbf16>
      %cst_15 = arith.constant dense<0.000000e+00> : vector<4x128xf32>
      %24 = tpu.matmul %23, %17, %cst_15 {dimension_numbers = #tpu.dot_dimension_numbers<[1], [0], [0], [1], [0, 0, 1, 1], [], []>} : vector<4x8xbf16>, vector<8x128xbf16>, vector<4x128xf32> -> vector<4x128xf32>
      %c0_16 = arith.constant 0 : index
      %c0_17 = arith.constant 0 : index
      %25 = vector.load %arg7[%c0_16, %c0_17] : memref<4x1xf32, #tpu.memory_space<vmem>>, vector<4x1xf32>
      %26 = vector.broadcast %25 : vector<4x1xf32> to vector<4x128xf32>
      %27 = arith.addf %24, %26 : vector<4x128xf32>
      %c0_18 = arith.constant 0 : index
      %c0_19 = arith.constant 0 : index
      %28 = vector.load %arg16[%c0_18, %c0_19] : memref<4x4xf32, #tpu.memory_space<vmem>>, vector<4x4xf32>
      %29 = arith.truncf %22 : vector<4x128xf32> to vector<4x128xbf16>
      %30 = arith.truncf %27 : vector<4x128xf32> to vector<4x128xbf16>
      %cst_20 = arith.constant dense<0.000000e+00> : vector<4x4xf32>
      %31 = tpu.matmul %29, %30, %cst_20 {dimension_numbers = #tpu.dot_dimension_numbers<[1], [1], [0], [0], [0, 0, 1, 0], [], []>} : vector<4x128xbf16>, vector<4x128xbf16>, vector<4x4xf32> -> vector<4x4xf32>
      %32 = arith.addf %28, %31 : vector<4x4xf32>
      %c0_21 = arith.constant 0 : index
      %c0_22 = arith.constant 0 : index
      %33 = vector.load %arg16[%c0_21, %c0_22] : memref<4x4xf32, #tpu.memory_space<vmem>>, vector<4x4xf32>
      tpu.vector_store %arg16[%c0_21, %c0_22], %32 {strides = array<i32>} : memref<4x4xf32, #tpu.memory_space<vmem>>, vector<4x4xf32>,
      %c1_i32_23 = arith.constant 1 : i32
      %34 = arith.cmpi eq, %arg2, %c1_i32_23 : i32
      %35 = arith.extui %34 : i1 to i32
      %c0_i32_24 = arith.constant 0 : i32
      %36 = arith.cmpi ne, %35, %c0_i32_24 : i32
      scf.if %36 {
        %c0_25 = arith.constant 0 : index
        %c0_26 = arith.constant 0 : index
        %37 = vector.load %arg16[%c0_25, %c0_26] : memref<4x4xf32, #tpu.memory_space<vmem>>, vector<4x4xf32>
        %cst_27 = arith.constant dense<0xFF800000> : vector<4xf32>
        %38 = vector.multi_reduction <maximumf>, %37, %cst_27 [1] : vector<4x4xf32> to vector<4xf32>
        %39 = vector.shape_cast %38 : vector<4xf32> to vector<4x1xf32>
        %40 = vector.broadcast %39 : vector<4x1xf32> to vector<4x4xf32>
        %41 = arith.subf %37, %40 : vector<4x4xf32>
        %42 = math.exp %41 : vector<4x4xf32>
        %cst_28 = arith.constant dense<0.000000e+00> : vector<4xf32>
        %43 = vector.multi_reduction <add>, %42, %cst_28 [1] : vector<4x4xf32> to vector<4xf32>
        %44 = vector.shape_cast %43 : vector<4xf32> to vector<4x1xf32>
        %45 = tpu.reciprocal %44 {approx = true} : vector<4x1xf32> -> vector<4x1xf32>
        %46 = vector.broadcast %45 : vector<4x1xf32> to vector<4x4xf32>
        %47 = arith.mulf %42, %46 : vector<4x4xf32>
        %48 = arith.truncf %47 : vector<4x4xf32> to vector<4x4xbf16>
        %c0_29 = arith.constant 0 : index
        %c0_30 = arith.constant 0 : index
        %49 = vector.load %arg17[%c0_29, %c0_30] : memref<4x4xbf16, #tpu.memory_space<vmem>>, vector<4x4xbf16>
        tpu.vector_store %arg17[%c0_29, %c0_30], %48 {strides = array<i32>} : memref<4x4xbf16, #tpu.memory_space<vmem>>, vector<4x4xbf16>,
      } else {
      }
    } else {
    }
    %c1_i32 = arith.constant 1 : i32
    %8 = arith.cmpi eq, %arg1, %c1_i32 : i32
    %9 = arith.extui %8 : i1 to i32
    %c0_i32_4 = arith.constant 0 : i32
    %10 = arith.cmpi ne, %9, %c0_i32_4 : i32
    scf.if %10 {
      %11 = arith.index_cast %arg2 : i32 to index
      %c0 = arith.constant 0 : index
      %c0_5 = arith.constant 0 : index
      %12 = vector.load %arg15[%11, %c0, %c0_5] : memref<2x8x128xf32, #tpu.memory_space<vmem>>, vector<1x8x128xf32>
      %13 = vector.shape_cast %12 : vector<1x8x128xf32> to vector<8x128xf32>
      %14 = arith.truncf %13 : vector<8x128xf32> to vector<8x128xbf16>
      %c0_6 = arith.constant 0 : index
      %c0_7 = arith.constant 0 : index
      %15 = vector.load %arg8[%c0_6, %c0_7] : memref<4x8xbf16, #tpu.memory_space<vmem>>, vector<4x8xbf16>
      %cst = arith.constant dense<0.000000e+00> : vector<4x128xf32>
      %16 = tpu.matmul %15, %14, %cst {dimension_numbers = #tpu.dot_dimension_numbers<[1], [0], [0], [1], [0, 0, 1, 1], [], []>} : vector<4x8xbf16>, vector<8x128xbf16>, vector<4x128xf32> -> vector<4x128xf32>
      %c0_8 = arith.constant 0 : index
      %c0_9 = arith.constant 0 : index
      %17 = vector.load %arg9[%c0_8, %c0_9] : memref<4x1xf32, #tpu.memory_space<vmem>>, vector<4x1xf32>
      %18 = vector.broadcast %17 : vector<4x1xf32> to vector<4x128xf32>
      %19 = arith.addf %16, %18 : vector<4x128xf32>
      %c0_10 = arith.constant 0 : index
      %c0_11 = arith.constant 0 : index
      %20 = vector.load %arg17[%c0_10, %c0_11] : memref<4x4xbf16, #tpu.memory_space<vmem>>, vector<4x4xbf16>
      %21 = arith.truncf %19 : vector<4x128xf32> to vector<4x128xbf16>
      %cst_12 = arith.constant dense<0.000000e+00> : vector<4x128xf32>
      %22 = tpu.matmul %20, %21, %cst_12 {dimension_numbers = #tpu.dot_dimension_numbers<[0], [0], [1], [1], [0, 1, 1, 1], [], []>} : vector<4x4xbf16>, vector<4x128xbf16>, vector<4x128xf32> -> vector<4x128xf32>
      %c0_13 = arith.constant 0 : index
      %c0_14 = arith.constant 0 : index
      %23 = vector.load %arg10[%c0_13, %c0_14] : memref<4x4xbf16, #tpu.memory_space<vmem>>, vector<4x4xbf16>
      %24 = arith.truncf %22 : vector<4x128xf32> to vector<4x128xbf16>
      %cst_15 = arith.constant dense<0.000000e+00> : vector<4x128xf32>
      %25 = tpu.matmul %23, %24, %cst_15 {dimension_numbers = #tpu.dot_dimension_numbers<[1], [0], [0], [1], [0, 0, 1, 1], [], []>} : vector<4x4xbf16>, vector<4x128xbf16>, vector<4x128xf32> -> vector<4x128xf32>
      %c0_16 = arith.constant 0 : index
      %c0_17 = arith.constant 0 : index
      %26 = vector.load %arg11[%c0_16, %c0_17] : memref<4x2xf32, #tpu.memory_space<vmem>>, vector<4x1xf32>
      %27 = vector.broadcast %26 : vector<4x1xf32> to vector<4x128xf32>
      %28 = arith.mulf %25, %27 : vector<4x128xf32>
      %c0_18 = arith.constant 0 : index
      %c1 = arith.constant 1 : index
      %29 = vector.load %arg11[%c0_18, %c1] : memref<4x2xf32, #tpu.memory_space<vmem>>, vector<4x1xf32>
      %30 = vector.broadcast %29 : vector<4x1xf32> to vector<4x128xf32>
      %31 = arith.addf %28, %30 : vector<4x128xf32>
      %c0_19 = arith.constant 0 : index
      %c0_20 = arith.constant 0 : index
      %32 = vector.load %arg12[%c0_19, %c0_20] : memref<8x4xbf16, #tpu.memory_space<vmem>>, vector<8x4xbf16>
      %33 = arith.truncf %31 : vector<4x128xf32> to vector<4x128xbf16>
      %cst_21 = arith.constant dense<0.000000e+00> : vector<8x128xf32>
      %34 = tpu.matmul %32, %33, %cst_21 {dimension_numbers = #tpu.dot_dimension_numbers<[1], [0], [0], [1], [0, 0, 1, 1], [], []>} : vector<8x4xbf16>, vector<4x128xbf16>, vector<8x128xf32> -> vector<8x128xf32>
      %c0_22 = arith.constant 0 : index
      %c0_23 = arith.constant 0 : index
      %35 = vector.load %arg13[%c0_22, %c0_23] : memref<8x2xf32, #tpu.memory_space<vmem>>, vector<8x1xf32>
      %36 = vector.broadcast %35 : vector<8x1xf32> to vector<8x128xf32>
      %37 = arith.mulf %34, %36 : vector<8x128xf32>
      %c0_24 = arith.constant 0 : index
      %c1_25 = arith.constant 1 : index
      %38 = vector.load %arg13[%c0_24, %c1_25] : memref<8x2xf32, #tpu.memory_space<vmem>>, vector<8x1xf32>
      %39 = vector.broadcast %38 : vector<8x1xf32> to vector<8x128xf32>
      %40 = arith.addf %37, %39 : vector<8x128xf32>
      %41 = arith.addf %40, %13 : vector<8x128xf32>
      %cst_26 = arith.constant 0.000000e+00 : f32
      %42 = vector.broadcast %cst_26 : f32 to vector<8x128xf32>
      %43 = arith.maximumf %41, %42 : vector<8x128xf32>
      %c0_27 = arith.constant 0 : index
      %c0_28 = arith.constant 0 : index
      %c0_29 = arith.constant 0 : index
      %44 = vector.load %arg14[%c0_27, %c0_28, %c0_29] : memref<1x8x128xf32, #tpu.memory_space<vmem>>, vector<1x8x128xf32>
      %45 = vector.shape_cast %44 : vector<1x8x128xf32> to vector<8x128xf32>
      %46 = vector.shape_cast %43 : vector<8x128xf32> to vector<1x8x128xf32>
      tpu.vector_store %arg14[%c0_27, %c0_28, %c0_29], %46 {strides = array<i32>} : memref<1x8x128xf32, #tpu.memory_space<vmem>>, vector<1x8x128xf32>,
    } else {
    }
    return
  }
  func.func @transform_0(%arg0: i32, %arg1: i32, %arg2: i32) -> (i32, i32, i32) {
    %c1_i32 = arith.constant 1 : i32
    %0 = arith.subi %c1_i32, %arg1 : i32
    %1 = arith.muli %arg2, %0 : i32
    %c1_i32_0 = arith.constant 1 : i32
    %2 = arith.muli %c1_i32_0, %arg1 : i32
    %3 = arith.addi %1, %2 : i32
    %c0_i32 = arith.constant 0 : i32
    %c0_i32_1 = arith.constant 0 : i32
    return %arg0, %c0_i32, %3 : i32, i32, i32
  }
  func.func @transform_1(%arg0: i32, %arg1: i32, %arg2: i32) -> (i32, i32) {
    %c0_i32 = arith.constant 0 : i32
    %c0_i32_0 = arith.constant 0 : i32
    %c0_i32_1 = arith.constant 0 : i32
    return %c0_i32, %c0_i32_0 : i32, i32
  }
  func.func @transform_2(%arg0: i32, %arg1: i32, %arg2: i32) -> (i32, i32) {
    %c0_i32 = arith.constant 0 : i32
    %c0_i32_0 = arith.constant 0 : i32
    %c0_i32_1 = arith.constant 0 : i32
    return %c0_i32, %c0_i32_0 : i32, i32
  }
  func.func @transform_3(%arg0: i32, %arg1: i32, %arg2: i32) -> (i32, i32) {
    %c0_i32 = arith.constant 0 : i32
    %c0_i32_0 = arith.constant 0 : i32
    %c0_i32_1 = arith.constant 0 : i32
    return %c0_i32, %c0_i32_0 : i32, i32
  }
  func.func @transform_4(%arg0: i32, %arg1: i32, %arg2: i32) -> (i32, i32) {
    %c0_i32 = arith.constant 0 : i32
    %c0_i32_0 = arith.constant 0 : i32
    %c0_i32_1 = arith.constant 0 : i32
    return %c0_i32, %c0_i32_0 : i32, i32
  }
  func.func @transform_5(%arg0: i32, %arg1: i32, %arg2: i32) -> (i32, i32) {
    %c0_i32 = arith.constant 0 : i32
    %c0_i32_0 = arith.constant 0 : i32
    %c0_i32_1 = arith.constant 0 : i32
    return %c0_i32, %c0_i32_0 : i32, i32
  }
  func.func @transform_6(%arg0: i32, %arg1: i32, %arg2: i32) -> (i32, i32) {
    %c0_i32 = arith.constant 0 : i32
    %c0_i32_0 = arith.constant 0 : i32
    %c0_i32_1 = arith.constant 0 : i32
    return %c0_i32, %c0_i32_0 : i32, i32
  }
  func.func @transform_7(%arg0: i32, %arg1: i32, %arg2: i32) -> (i32, i32) {
    %c0_i32 = arith.constant 0 : i32
    %c0_i32_0 = arith.constant 0 : i32
    %c0_i32_1 = arith.constant 0 : i32
    return %c0_i32, %c0_i32_0 : i32, i32
  }
  func.func @transform_8(%arg0: i32, %arg1: i32, %arg2: i32) -> (i32, i32) {
    %c0_i32 = arith.constant 0 : i32
    %c0_i32_0 = arith.constant 0 : i32
    %c0_i32_1 = arith.constant 0 : i32
    return %c0_i32, %c0_i32_0 : i32, i32
  }
  func.func @transform_9(%arg0: i32, %arg1: i32, %arg2: i32) -> (i32, i32) {
    %c0_i32 = arith.constant 0 : i32
    %c0_i32_0 = arith.constant 0 : i32
    %c0_i32_1 = arith.constant 0 : i32
    return %c0_i32, %c0_i32_0 : i32, i32
  }
  func.func @transform_10(%arg0: i32, %arg1: i32, %arg2: i32) -> (i32, i32) {
    %c0_i32 = arith.constant 0 : i32
    %c0_i32_0 = arith.constant 0 : i32
    %c0_i32_1 = arith.constant 0 : i32
    return %c0_i32, %c0_i32_0 : i32, i32
  }
  func.func @transform_11(%arg0: i32, %arg1: i32, %arg2: i32) -> (i32, i32, i32) {
    %0 = arith.muli %arg1, %arg2 : i32
    %c0_i32 = arith.constant 0 : i32
    %c0_i32_0 = arith.constant 0 : i32
    return %arg0, %c0_i32, %0 : i32, i32, i32
  }
}

</mosaic_0001>

<bundles_post_ra>
// kernel: tpu_custom_call.1
= control target key start
LH: loop header
LB: loop body
LE: loop exit
PB: predicated region body
PF: predicated region fallthrough
CT: control target
= control target key end

     0   :  { %s1483_s0 = inlined_call_operand.hbm [shape: f32[2,8,256], index: 0, kind: input, shape index: {}]   ;;  %s1484_s1 = inlined_call_operand.vmem [shape: bf16[4,8], index: 1, kind: input, shape index: {}]   ;;  %s1485_s2 = inlined_call_operand.vmem [shape: f32[4,1], index: 2, kind: input, shape index: {}]   ;;  %s1486_s3 = inlined_call_operand.vmem [shape: bf16[4,8], index: 3, kind: input, shape index: {}]   ;;  %s1487_s4 = inlined_call_operand.vmem [shape: f32[4,1], index: 4, kind: input, shape index: {}]   ;;  %s1488_s5 = inlined_call_operand.vmem [shape: bf16[4,8], index: 5, kind: input, shape index: {}]   ;;  %s1489_s6 = inlined_call_operand.vmem [shape: f32[4,1], index: 6, kind: input, shape index: {}]   ;;  %s1490_s7 = inlined_call_operand.vmem [shape: bf16[4,4], index: 7, kind: input, shape index: {}]   ;;  %s1491_s8 = inlined_call_operand.vmem [shape: f32[4,2], index: 8, kind: input, shape index: {}]   ;;  %s1492_s9 = inlined_call_operand.vmem [shape: bf16[8,4], index: 9, kind: input, shape index: {}]   ;;  %s1493_s10 = inlined_call_operand.vmem [shape: f32[8,2], index: 10, kind: input, shape index: {}]   ;;  %s1494_s11 = inlined_call_operand.hbm [shape: f32[2,8,256], index: 11, kind: output, shape index: {}]  }
   0x1   :  { %1503 = sst [smem:[#allocation20_spill]] %s1483_s0 }
   0x2   :  { %1504 = sst [smem:[#allocation21_spill]] %s1485_s2 }
   0x3   :  { %1505 = sst [smem:[#allocation22_spill]] %s1488_s5 }
   0x4   :  { %1506 = sst [smem:[#allocation23_spill]] %s1489_s6 }
   0x5   :  { %1507 = sst [smem:[#allocation24_spill]] %s1490_s7 }
   0x6   :  { %1508 = sst [smem:[#allocation25_spill]] %s1491_s8 }
   0x7   :  { %1509 = sst [smem:[#allocation26_spill]] %s1492_s9 }
   0x8   :  { %1510 = sst [smem:[#allocation27_spill]] %s1493_s10 }
   0x9   :  { %1511 = sst [smem:[#allocation28_spill]] %s1494_s11 }
   0xa   :  { %16 = vsyncpa [#allocation6], 0 }
   0xb   :  { %18 = vsyncpa [#allocation6 + $0x1], 0 }
   0xc   :  { %19 = vsyncpa [#allocation7], 0 }
   0xd   :  { %21 = vsyncpa [#allocation7 + $0x1], 0  ;;  %s1202_s17 = smov 0   ;;  %s1204_s18 = smov 0  }
   0xe   :  { %s1206_s19 = smov 0   ;;  %s1208_s20 = smov 0  }
   0xf   :  { %s1210_s21 = smov 0   ;;  %s1212_s22 = smov 0  }
  0x10   :  { %s1214_s23 = smov 0   ;;  %s1216_s24 = smov 0  }
  0x11   :  { %s1218_s25 = smov 0   ;;  %s1220_s26 = smov 0  }
  0x12   :  { %s1222_s27 = smov 0   ;;  %s1224_s28 = smov 0  }
  0x13   :  { %s1226_s29 = smov 0  }
  0x14 LB: > { %1512 = sst [smem:[#allocation11_spill]] %s1108_s22  ;;  %s39_s13 = sadd.s32 1, %s1124_s26  ;;  %s1136_s29 = sphi %s1226_s29, %s27_s29   ;;  %s1132_s28 = sphi %s1224_s28, %s1548_s28   ;;  %s1128_s27 = sphi %s1222_s27, %s1547_s27   ;;  %s1124_s26 = sphi %s1220_s26, %s1546_s26   ;;  %s1120_s25 = sphi %s1218_s25, %s1545_s25   ;;  %s1116_s24 = sphi %s1216_s24, %s1544_s24   ;;  %s1112_s23 = sphi %s1214_s23, %s1543_s23   ;;  %s1108_s22 = sphi %s1212_s22, %s1542_s22   ;;  %s1104_s21 = sphi %s1210_s21, %s1553_s21   ;;  %s1100_s20 = sphi %s1208_s20, %s1552_s20   ;;  %s1096_s19 = sphi %s1206_s19, %s1551_s19   ;;  %s1092_s18 = sphi %s1204_s18, %s1550_s18   ;;  %s1088_s17 = sphi %s1202_s17, %s1549_s17  }
  0x15   : > { %1513 = sst [smem:[#allocation12_spill]] %s1120_s25  ;;  %s42_s14 = sadd.s32 1, %s1128_s27 }
  0x16   : > { %1514 = sst [smem:[#allocation13_spill]] %s1124_s26  ;;  %p40_p0 = scmp.ge.s32.totalorder %s39_s13, 2 }
  0x17   : > { %1515 = sst [smem:[#allocation14_spill]] %s1128_s27  ;;  %s46_s15 = sadd.s32 1, %s1132_s28 }
  0x18   : > { %1516 = sst [smem:[#allocation15_spill]] %s1132_s28  ;;  %s50_s16 = ssub.s32 1, %s1128_s27 }
  0x19   : > { %s61_s11 = sadd.s32 1, %s1108_s22  ;;  %s1555_s13 = smov (%p40_p0, %s39_s13), 0 }
  0x1a   : > { %1517 = sst [smem:[#allocation16_spill]] %s1555_s13  ;;  %s1557_s14 = smov (!%p40_p0, %s42_s14), %s1128_s27 }
  0x1b   : > { %s51_s25 = smul.u32 %s1124_s26, %s50_s16  ;;  %p68_p1 = scmp.ne.s32.totalorder %s1108_s22, %s1104_s21 }
  0x1c   : > { %p44_p2 = scmp.ge.s32.totalorder %s1557_s14, 2  ;;  %p69_p3 = scmp.eq.s32.totalorder %s1136_s29, 0 }
  0x1d   : > { %s1282_s12 = sadd.s32 %s1128_s27, %s51_s25  ;;  %p74_p4 = scmp.ne.s32.totalorder %s1104_s21, %s1100_s20 }
  0x1e   : > { %s1559_s14 = smov (%p44_p2, %s1557_s14), 0  ;;  %s1561_s15 = smov (!%p44_p2, %s46_s15), %s1132_s28 }
  0x1f   : > { %1518 = sst [smem:[#allocation17_spill]] %s1559_s14  ;;  %s53_s30 = ssub.s32 1, %s1559_s14 }
  0x20   : > { %p1290_p5 = por %p69_p3, %p68_p1  ;;  %p48_p6 = scmp.ge.s32.totalorder %s1561_s15, 2 }
  0x21   : > { %s54_s25 = smul.u32 %s53_s30, %s1555_s13  ;;  %s1520_s9 = sadd.s32 4294967295, %s1136_s29  }
  0x22   : > { %p75_p7 = scmp.eq.s32.totalorder %s1520_s9, 0  ;;  %s294_s20 = smul.u32 %s1124_s26, %s1128_s27 }
  0x23   : > { %s1563_s15 = smov (%p48_p6, %s1561_s15), 0  ;;  %s55_s10 = sadd.s32 %s54_s25, %s1559_s14 }
  0x24   : > { %1521 = sst [smem:[#allocation18_spill]] %s1563_s15  ;;  %p1302_p8 = por %p75_p7, %p74_p4 }
  0x25   : > { %s56_s8 = ssub.s32 %s1132_s28, %s1563_s15  ;;  %s57_s5 = ssub.s32 %s1282_s12, %s55_s10 }
  0x26   : > { %s58_s30 = sor.u32 %s57_s5, %s56_s8  ;;  %s295_s6 = smul.u32 %s1559_s14, %s1555_s13 }
  0x27   : > { %p59_p9 = scmp.eq.s32.totalorder %s58_s30, 0  ;;  %s301_s9 = sadd.s32 1, %s1096_s19 }
  0x28   : > { %s297_s27 = ssub.s32 %s294_s20, %s295_s6  ;;  %p311_p10 = scmp.ne.s32.totalorder %s1096_s19, %s1092_s18 }
  0x29   : > { %s1315_s26 = scalar_select %p59_p9, %s1108_s22, %s61_s11  }
  0x2a   : > { %s298_s25 = sor.u32 %s297_s27, %s56_s8  ;;  %s1524_s2 = sadd.s32 4294967295, %s1136_s29  }
  0x2b   : > { %1523 = sst [smem:[#allocation19_spill]] %s1315_s26  ;;  %p312_p11 = scmp.eq.s32.totalorder %s1524_s2, 7 }
  0x2c   : > { %p299_p12 = scmp.eq.s32.totalorder %s298_s25, 0  ;;  %p317_p13 = scmp.ne.s32.totalorder %s1092_s18, %s1088_s17 }
  0x2d   : > { %p1321_p0 = por %p312_p11, %p311_p10  ;;  %s1526_s5 = sadd.s32 4294967294, %s1136_s29  }
  0x2e   : > { %p318_p1 = scmp.eq.s32.totalorder %s1526_s5, 7  ;;  %p847_p3 = scmp.lt.s32.totalorder %s1136_s29, 8 }
  0x2f   : > { %s1328_s30 = scalar_select %p299_p12, %s1096_s19, %s301_s9  }
  0x30   : > { %p1330_p2 = por %p318_p1, %p317_p13  ;;  %s368_s8 = sand.u32 1, %s1108_s22  }
  0x31   : > { %s813_s11 = sshll.u32 %s368_s8, 3  ;;  %s814_s2 = sshll.u32 %s1132_s28, 1 }
  0x32   : > { %s379_s27 = sadd.s32 %s814_s2, %s1282_s12  ;;  %s372_s20 = scalar_lea.vmem [#allocation5], %s813_s11 }
  0x33   : > { %s385_s25 = sshll.u32 %s372_s20, 4  ;;  %s815_s15 = sshll.u32 %s379_s27, 3  ;;  %s386_s25 = int_to_ptr.vmem [resolvable:$true] %s385_s25 }
  0x34   : > { %s1528_s0 = sld [smem:[#allocation20_spill]]  ;;  %p1343_p4 = pnand %p847_p3, %p1290_p5 }
  0x35   : > { %p816_p6 = scmp.ge.s32.totalorder %s1136_s29, 1  ;;  %s369_s22 = scalar_lea.sflag [#allocation6], %s368_s8 }
  0x36   : > { %p972_p9 = pneg %p1343_p4 }
  0x3a   : > { %s381_s26 = scalar_lea.hbm %s1528_s0, %s815_s15  ;;  %s975_s15 = scalar_lea.hbm %s1528_s0, 32 }
  0x3b   : > { %s383_s5 = sshll.u32 %s381_s26, 4  ;;  %s384_s5 = int_to_ptr.hbm [resolvable:$true] %s383_s5 }
  0x3c   : > { %s968_s28 = sshra.s32 %s384_s5, 4  ;;  %s969_s28 = int_to_ptr.hbm [resolvable:$true] %s968_s28 }
  0x3d   : > { %s970_s12 = scalar_lea.hbm %s969_s28, 8 }
  0x3e   : > { %p971_p7 = scmp.ne.s32.totalorder %s969_s28, %s970_s12  ;;  %p977_p5 = scmp.lt.s32.totalorder %s975_s15, %s970_s12 }
  0x40   : > { %p973_p10 = pnand %p972_p9, %p971_p7 }
  0x42   : > { %p974_p11 = pneg %p973_p10 }
  0x44   : > { %p979_p12 = pnand %p977_p5, %p974_p11 }
  0x46   : > { %982 = shalt.err (!%p979_p12)
}
  0x47   : > { %842 = dma.hbm_to_vmem [thread:$0]  (!%p1343_p4), %s384_s5, 128, %s386_s25, %s369_s22  }
  0x48   : > { %p390_p13 = scmp.lt.s32.totalorder %s1136_s29, 9 }
  0x4a   : > { %p391_p1 = pnand %p816_p6, %p390_p13 }
  0x4b   : > { %s396_s26 = sand.u32 (!%p391_p1), 1, %s1104_s21  }
  0x4c   : > { %394 = sbr.rel (%p391_p1) target bundleno = 1298 (0x512), region = 64  ;;  %s817_s28 = sshll.u32 (!%p391_p1), %s396_s26, 3 }
  0x4d   : > { %s397_s16 = scalar_lea.sflag (!%p391_p1), [#allocation6], %s396_s26  ;;  %s400_s8 = scalar_lea.vmem (!%p391_p1), [#allocation5], %s817_s28 }
  0x51   : > { %1079 = dma.done.wait (%p1302_p8), %s397_s16, 128  }
  0x52   : > { %1081 = vsyncadd (%p1302_p8), %s397_s16, 4294967168  ;;  %s437_s22 = sand.u32 1, %s1092_s18   ;;  %p445_p3 = scmp.eq.s32.totalorder %s1116_s24, 0 }
  0x53   : > { %s1367_s11 = sshll.u32 %s437_s22, 3  ;;  %p446_p4 = scmp.eq.s32.totalorder %s1112_s23, 0 }
  0x54   : > { %s439_s2 = scalar_lea.vmem [#allocation8], %s1367_s11 }
  0x55   : > { %p447_p6 = pnand %p446_p4, %p445_p3 }
  0x57   : > { %450 = sbr.rel (%p447_p6) target bundleno = 94 (0x5e), region = 72 }
  0x5c   : > { %vm451_vm0 = vcmask 27648   ;;  %v1138_v0 = vmov 0.0  }
  0x5d   : > { %452 = vst.msk [vmem:[#allocation3] sm:$0xf] %vm451_vm0, %v1138_v0 }
  0x5e PF: > { %p819_p8 = scmp.ne.s32.totalorder %s1116_s24, 0 }
  0x5f   : > { %s820_s7 = sshll.u32 (!%p819_p8), %s1112_s23, 3  ;;  %s1530_s26 = sld [smem:[#allocation21_spill]] (!%p819_p8) }
  0x60   : > { %455 = sbr.rel (%p819_p8) target bundleno = 644 (0x284), region = 76  ;;  %s458_s25 = scalar_lea.vmem (!%p819_p8), [#allocation2], %s820_s7 }
  0x61   : > { %p823_p7 = scmp.ne.s32.totalorder (!%p819_p8), %s1112_s23, 1 }
  0x65   : > { %v456_v1 = vld [vmem:[%s400_s8] sm:$0xff]  ;;  %vm472_vm1 = vcmask 1043456   ;;  %v1139_v4 = vmov 0   ;;  %vm468_vm2 = vcmask 64512   ;;  %v512_v19 = vld [vmem:[#allocation3] sm:$0xf] }
  0x66   : > { %v460_v2 = vpack.c.bf16 %v456_v1, %v456_v1  ;;  %v490_v3 = vld [vmem:[%s1487_s4] sm:$0xf]  ;;  %459 = vst [vmem:[%s458_s25] sm:$0xff] %v456_v1  ;;  %957 = vset.pattern.permute.xlu0 %v1139_v4  ;;  %vm529_vm3 = vcmask 27648  }
  0x67   : > { %493 = vperm.xlu0 %957, %v490_v3   ;;  %v461_v6 = vld [vmem:[%s1484_s1] sm:$0x3] }
  0x68   : > { %v474_v5 = vsel %vm472_vm1, %v460_v2, 0  ;;  %v489_v7 = vld [vmem:[%s1486_s3] sm:$0x3] }
  0x69   : > { %483 = vmatpush.bf16.msra.mxu0 %v474_v5  ;;  %506 = vmatpush.bf16.msra.mxu1 %v474_v5  ;;  %v462_v8 = vld [vmem:[%s1530_s26] sm:$0xf] }
  0x6c   : > { %821 = vmatmul.msk.bf16.vlgmr.msra.gmra.mxu0 %vm468_vm2, %v461_v6  ;;  %822 = vmatmul.msk.bf16.vlgmr.msra.gmra.mxu1 %vm468_vm2, %v489_v7 }
  0x6f   : > { %465 = vperm.xlu0 %957, %v462_v8  }
  0xd9   : > { %v494_v9 = vpop.permute.xlu0 %493 }
  0xe1   : > { %v466_v13 = vpop.permute.xlu0 %465 }
  0xe9   : > { %v485_v10 = vpop.f32.mrf.mxu0  ;;  %v508_v11 = vpop.f32.mrf.mxu1 }
  0xea   : > { %v509_v12 = vadd.f32 %v508_v11, %v494_v9  ;;  %v486_v15 = vadd.f32 %v485_v10, %v466_v13 }
  0xec   : > { %v514_v14 = vpack.c.bf16 %v509_v12, %v509_v12  ;;  %v513_v18 = vpack.c.bf16 %v486_v15, %v486_v15 }
  0xee   : > { %522 = vmatpush.bf16.xpose.msra.mxu2 %v514_v14 }
  0xf1   : > { %v487_v16 = vpop.f32.mrf.mxu0  ;;  %v510_v17 = vpop.f32.mrf.mxu1 }
  0xf5   : > { %523 = vmatmul.bf16.vlgmr.msra.gmra.mxu2 %v513_v18 }
 0x178   : > { %v524_v20 = vpop.f32.mrf.mxu2 }
 0x179   : > { %v528_v21 = vadd.f32 %v524_v20, %v512_v19 }
 0x17b   : > { %530 = vst.msk [vmem:[#allocation3] sm:$0xf] %vm529_vm3, %v528_v21 }
 0x17c   : > { %534 = sbr.rel (%p823_p7) target bundleno = 644 (0x284), region = 80 }
 0x180   : > { %v526_v22 = vpop.f32.mrf.mxu2 }
 0x181   : > { %vm548_vm4 = vcmask 25600  }
 0x182   : > { %v535_v23 = vld [vmem:[#allocation3] sm:$0xf] }
 0x183   : > { %v536_v24 = vsel %vm529_vm3, %v535_v23, -inf }
 0x184   : > { %537 = vmax.xlane.f32.xlu0 %v536_v24 }
 0x1f7   : > { %v538_v25 = vpop.xlane.xlu0 %537 }
 0x1f8   : > { %v539_v26 = vsub.f32 %v535_v23, %v538_v25 }
 0x1fa   : > { %v540_v27 = vmul.f32 1.442695, %v539_v26 }
 0x1fc   : > { %958 = vpow2.f32 %v540_v27 }
 0x202   : > { %v959_v28 = vpop.eup %958 }
 0x203   : > { %v542_v29 = vsel %vm529_vm3, %v959_v28, 0.0 }
 0x204   : > { %543 = vadd.xlane.f32.xlu0 %v542_v29 }
 0x277   : > { %v544_v30 = vpop.xlane.xlu0 %543 }
 0x278   : > { %960 = vrcp.f32 %v544_v30 }
 0x27e   : > { %v961_v31 = vpop.eup %960 }
 0x27f   : > { %v546_v32 = vmul.f32 %v961_v31, %v959_v28 }
 0x281   : > { %v547_v33 = vpack.c.bf16 %v546_v32, %v546_v32 }
 0x283   : > { %549 = vst.msk [vmem:[#allocation4] sm:$0x3] %vm548_vm4, %v547_v33 }
 0x284 PF: > { %p824_p9 = scmp.ne.s32.totalorder %s1116_s24, 1 }
 0x285   : > { %s1531_s8 = sld [smem:[#allocation23_spill]] (!%p824_p9)  ;;  %s825_s7 = sshll.u32 (!%p824_p9), %s1112_s23, 3 }
 0x286   : > { %553 = sbr.rel (%p824_p9) target bundleno = 1275 (0x4fb), region = 84  ;;  %s555_s27 = scalar_lea.vmem (!%p824_p9), [#allocation2], %s825_s7 }
 0x287   : > { %s1532_s9 = sld [smem:[#allocation22_spill]] (!%p824_p9) }
 0x288   : > { %s1533_s13 = sld [smem:[#allocation25_spill]] (!%p824_p9) }
 0x289   : > { %s1534_s26 = sld [smem:[#allocation24_spill]] (!%p824_p9) }
 0x28a   : > { %s1536_s20 = sld [smem:[#allocation26_spill]] (!%p824_p9) }
 0x28b   : > { %v559_v34 = vld [vmem:[%s1531_s8] sm:$0xf]  ;;  %v1140_v35 = vmov 0   ;;  %vm569_vm5 = vcmask 1043456   ;;  %vm565_vm6 = vcmask 64512   ;;  %vm608_vm7 = vcmask 1041408  }
 0x28c   : > { %962 = vset.pattern.permute.xlu0 %v1140_v35  ;;  %963 = vset.pattern.permute.xlu1 %v1140_v35  ;;  %v556_v36 = vld [vmem:[%s555_s27] sm:$0xff]  ;;  %v586_v40 = vld [vmem:[#allocation4] sm:$0x3]  ;;  %vm604_vm8 = vcmask 31744   ;;  %v1141_v49 = vmov 1   ;;  %s1535_s8 = sld [smem:[#allocation27_spill]] }
 0x28d   : > { %562 = vperm.xlu0 %962, %v559_v34   ;;  %965 = vset.pattern.permute.xlu2 %v1140_v35  ;;  %v557_v37 = vpack.c.bf16 %v556_v36, %v556_v36  ;;  %v558_v39 = vld [vmem:[%s1532_s9] sm:$0x3] }
 0x28e   : > { %v646_v48 = vld [vmem:[%s1533_s13] sm:$0xf] }
 0x28f   : > { %v571_v38 = vsel %vm569_vm5, %v557_v37, 0  ;;  %649 = vperm.xlu1 %963, %v646_v48   ;;  %v625_v53 = vld [vmem:[%s1534_s26] sm:$0x3] }
 0x290   : > { %580 = vmatpush.bf16.msra.mxu0 %v571_v38  ;;  %v658_v0 = vld [vmem:[%s1536_s20] sm:$0xf] }
 0x292   : > { %v679_v55 = vld [vmem:[%s1535_s8] sm:$0xff] }
 0x293   : > { %826 = vmatmul.msk.bf16.vlgmr.msra.gmra.mxu0 %vm565_vm6, %v558_v39  ;;  %682 = vperm.xlu2 %965, %v679_v55  }
 0x297   : > { %964 = vset.pattern.permute.xlu1 %v1141_v49 }
 0x298   : > { %654 = vperm.xlu1 %964, %v646_v48  }
 0x29b   : > { %966 = vset.pattern.permute.xlu2 %v1141_v49 }
 0x29c   : > { %687 = vperm.xlu2 %966, %v679_v55  }
 0x2af   : > { %588 = vxpose.xlu0.c.b16.start.end [1/1] (short) (narrow) %v586_v40, 16 }
 0x2ed   : > { %v683_v1 = vpop.permute.xlu2 %682 }
 0x2f6   : > { %v688_v3 = vpop.permute.xlu2 %687 }
 0x2ff   : > { %v563_v41 = vpop.permute.xlu0 %562 }
 0x301   : > { %v650_v56 = vpop.permute.xlu1 %649 }
 0x30a   : > { %v655_v58 = vpop.permute.xlu1 %654 }
 0x310   : > { %v582_v42 = vpop.f32.mrf.mxu0 }
 0x311   : > { %v583_v43 = vadd.f32 %v582_v42, %v563_v41 }
 0x313   : > { %v587_v44 = vpack.c.bf16 %v583_v43, %v583_v43 }
 0x315   : > { %v610_v45 = vsel %vm608_vm7, %v587_v44, 0 }
 0x316   : > { %619 = vmatpush.bf16.msra.mxu1 %v610_v45  ;;  %967 = vset.pattern.permute.xlu0 %v1141_v49 }
 0x318   : > { %v584_v46 = vpop.f32.mrf.mxu0 }
 0x35b   : > { %v596_v47 = vpop.trf.xlu0 }
 0x35c   : > { %827 = vmatmul.msk.bf16.vlgmr.msra.gmra.mxu1 %vm604_vm8, %v596_v47 }
 0x3d9   : > { %v621_v50 = vpop.f32.mrf.mxu1 }
 0x3da   : > { %v626_v51 = vpack.c.bf16 %v621_v50, %v621_v50 }
 0x3dc   : > { %v631_v52 = vsel %vm608_vm7, %v626_v51, 0 }
 0x3dd   : > { %640 = vmatpush.bf16.msra.mxu2 %v631_v52 }
 0x3e0   : > { %828 = vmatmul.msk.bf16.vlgmr.msra.gmra.mxu2 %vm604_vm8, %v625_v53 }
 0x3e1   : > { %v623_v54 = vpop.f32.mrf.mxu1 }
 0x463   : > { %v642_v57 = vpop.f32.mrf.mxu2 }
 0x464   : > { %v652_v59 = vmul.f32 %v650_v56, %v642_v57 }
 0x466   : > { %v657_v60 = vadd.f32 %v655_v58, %v652_v59 }
 0x468   : > { %v659_v61 = vpack.c.bf16 %v657_v60, %v657_v60 }
 0x46a   : > { %v664_v62 = vsel %vm608_vm7, %v659_v61, 0 }
 0x46b   : > { %v644_v63 = vpop.f32.mrf.mxu2  ;;  %673 = vmatpush.bf16.msra.mxu3 %v664_v62 }
 0x46e   : > { %829 = vmatmul.msk.bf16.vlgmr.msra.gmra.mxu3 %vm604_vm8, %v658_v0 }
 0x4f1   : > { %v675_v2 = vpop.f32.mrf.mxu3 }
 0x4f2   : > { %v685_v4 = vmul.f32 %v683_v1, %v675_v2 }
 0x4f4   : > { %v690_v5 = vadd.f32 %v688_v3, %v685_v4 }
 0x4f6   : > { %v691_v6 = vadd.f32 %v690_v5, %v556_v36 }
 0x4f8   : > { %v692_v7 = vmax.f32 %v691_v6, 0.0 }
 0x4f9   : > { %v677_v8 = vpop.f32.mrf.mxu3 }
 0x4fa   : > { %693 = vst [vmem:[%s439_s2] sm:$0xff] %v692_v7 }
 0x4fb PF: > { %s1537_s25 = sld [smem:[#allocation12_spill]]  ;;  %s702_s9 = smul.u32 %s1112_s23, %s1116_s24 }
 0x4fc   : > { %s710_s12 = sshll.u32 %s439_s2, 4  ;;  %s1538_s28 = sld [smem:[#allocation28_spill]]  ;;  %s711_s12 = int_to_ptr.vmem [resolvable:$true] %s710_s12 }
 0x4fd   : > { %s695_s27 = scalar_lea.sflag [#allocation7], %s437_s22 }
 0x501   : > { %s831_s5 = sshll.u32 %s1537_s25, 1 }
 0x502   : > { %s706_s13 = sadd.s32 %s831_s5, %s702_s9  ;;  %s1539_s16 = smov %s1538_s28 }
 0x503   : > { %s832_s14 = sshll.u32 %s706_s13, 3  ;;  %s1018_s11 = scalar_lea.hbm %s1539_s16, 32 }
 0x504   : > { %s708_s8 = scalar_lea.hbm %s1538_s28, %s832_s14 }
 0x505   : > { %s712_s7 = sshll.u32 %s708_s8, 4  ;;  %s713_s7 = int_to_ptr.hbm [resolvable:$true] %s712_s7 }
 0x506   : > { %s1012_s20 = sshra.s32 %s713_s7, 4  ;;  %s1013_s20 = int_to_ptr.hbm [resolvable:$true] %s1012_s20 }
 0x507   : > { %s1014_s0 = scalar_lea.hbm %s1013_s20, 8  ;;  %p1019_p12 = scmp.lt.s32.totalorder %s1013_s20, %s1539_s16 }
 0x508   : > { %p1015_p10 = scmp.ne.s32.totalorder %s1013_s20, %s1014_s0  ;;  %p1020_p13 = scmp.lt.s32.totalorder %s1018_s11, %s1014_s0 }
 0x50a   : > { %p1016_p11 = pnand %p1015_p10, %p1321_p0  ;;  %p1021_p1 = por %p1020_p13, %p1019_p12 }
 0x50c   : > { %p1017_p5 = pneg %p1016_p11 }
 0x50e   : > { %p1022_p3 = pnand %p1021_p1, %p1017_p5 }
 0x510   : > { %1025 = shalt.err (!%p1022_p3)
}
 0x511   : > { %837 = dma.vmem_to_hbm [thread:$0]  (%p1321_p0), %s711_s12, 128, %s713_s7, %s695_s27  }
 0x512 PF: > { %p848_p4 = scmp.ge.s32.totalorder %s1136_s29, 2  ;;  %s724_s22 = sand.u32 1, %s1088_s17  }
 0x513   : > { %s725_s9 = scalar_lea.sflag [#allocation7], %s724_s22 }
 0x514   : > { %p844_p6 = pnand %p848_p4, %p1330_p2 }
 0x516   : > { %p845_p8 = pneg %p844_p6 }
 0x518   : > { %1083 = dma.done.wait (%p845_p8), %s725_s9, 128  }
 0x519   : > { %1085 = vsyncadd (%p845_p8), %s725_s9, 4294967168  ;;  %s27_s29 = sadd.s32 1, %s1136_s29   ;;  %s1541_s10 = sld [smem:[#allocation11_spill]] }
 0x51a   : > { %p1439_p7 = scmp.ge.s32.totalorder %s27_s29, 10   ;;  %s1542_s22 = sld [smem:[#allocation19_spill]] }
 0x51b   : > { %s1543_s23 = sld [smem:[#allocation13_spill]]  ;;  %s1549_s17 = smov %s1092_s18 }
 0x51c   : > { %s1544_s24 = sld [smem:[#allocation14_spill]]  ;;  %s1550_s18 = smov %s1096_s19 }
 0x51d   : > { %s1545_s25 = sld [smem:[#allocation15_spill]]  ;;  %s1551_s19 = smov %s1328_s30 }
 0x51e   : > { %s1546_s26 = sld [smem:[#allocation16_spill]]  ;;  %s1552_s20 = smov %s1104_s21 }
 0x51f   : > { %s1547_s27 = sld [smem:[#allocation17_spill]]  ;;  %s1553_s21 = smov %s1541_s10 }
 0x520   : > { %s1548_s28 = sld [smem:[#allocation18_spill]]  ;;  %26 = sbr.rel (!%p1439_p7) target bundleno = 20 (0x14), region = 127 }
 0x525   :  { %731 = vsyncpa [#allocation6], 1 }
 0x526   :  { %733 = vsyncpa [#allocation6 + $0x1], 1 }
 0x527   :  { %734 = vsyncpa [#allocation7], 1 }
 0x528   :  { %736 = vsyncpa [#allocation7 + $0x1], 1 }

</bundles_post_ra>
